<compile_context>
chip_gen: v6e
topology: v6e:2x2x1
jax: 0.10.0
libtpu: 0.0.40
codegen_flags: <defaults>
</compile_context>

<pallas_src>
import jax
import jax.numpy as jnp
from jax.experimental import pallas as pl
from jax.experimental.pallas import tpu as pltpu

HIDDEN = 128
NEG_SLOPE = 0.02


def _leaky_relu(x):
    # For 0 < slope < 1 this equals LeakyReLU; mul+max (2 VALU ops).
    return jnp.maximum(x, NEG_SLOPE * x)


def generator_kernel(x_ref,
                     w1_ref, b1_ref,
                     w2_ref, b2_ref,
                     w3_ref, b3_ref,
                     w4_ref, b4_ref,
                     o_ref):
    # Feature-major: x tile is (1, TB), activations are (128, TB).
    x = x_ref[...]                                          # (1, TB) f32

    # Layer 1: Linear(1 -> 128). K == 1 -> broadcast outer product on the VPU:
    # (128, 1) * (1, TB) -> (128, TB).
    h = _leaky_relu(w1_ref[...] * x + b1_ref[...])

    # Layers 2-3: Linear(128 -> 128) on the MXU, bf16 operands, f32 accumulate.
    # Weights are in PyTorch (out, in) layout, so feature-major is W @ h + b.
    h = _leaky_relu(
        jnp.dot(w2_ref[...], h.astype(jnp.bfloat16),
                preferred_element_type=jnp.float32) + b2_ref[...])
    h = _leaky_relu(
        jnp.dot(w3_ref[...], h.astype(jnp.bfloat16),
                preferred_element_type=jnp.float32) + b3_ref[...])

    # Output layer: Linear(128 -> 1). N == 1 -> mul + sublane reduce (VPU/XLU)
    # instead of a degenerate MXU matmul; result stays lane-dense (1, TB).
    y = jnp.sum(w4_ref[...] * h, axis=0, keepdims=True) + b4_ref[0, 0]

    o_ref[...] = jnp.tanh(y)


def generator_forward(x, params, *, tile_b=4096):
    """x: (B, 1) f32. params: dict (see init_params). Returns (B, 1) f32."""
    B, F = x.shape
    assert F == 1

    w1, b1 = params["w1"], params["b1"]   # (128, 1),   (128, 1)   f32
    w3, b3 = params["w3"], params["b3"]   # (128, 128), (128, 1)   f32
    w4, b4 = params["w4"], params["b4"]   # (128, 1),   (1, 1)     f32
    b2 = params["b2"]                     # (128, 1)               f32
    # bf16 weights for the two MXU layers (one-off cast; fuses away under jit,
    # or pre-store bf16 in params for repeated calls).
    w2 = params["w2"].astype(jnp.bfloat16)
    w3 = w3.astype(jnp.bfloat16)

    # Feature-major input: (B, 1) -> (1, B) is a free reshape (F == 1), padded
    # to a lane-dense, tile-aligned width.
    b_pad_min = ((B + 255) // 256) * 256
    tile_b_eff = max(256, (min(tile_b, b_pad_min) // 256) * 256)
    n_tiles = pl.cdiv(b_pad_min, tile_b_eff)
    b_pad = n_tiles * tile_b_eff
    x_fm = jnp.pad(x.reshape(1, B), ((0, 0), (0, b_pad - B)))   # (1, b_pad)

    def const_block(arr):
        # Weight/bias blocks are whole arrays, identical for every grid step
        # (constant index_map -> resident / not re-fetched).
        return pl.BlockSpec(arr.shape, lambda i: tuple(0 for _ in arr.shape))

    flops = b_pad * (2 * HIDDEN + 2 * (2 * HIDDEN * HIDDEN) + 2 * HIDDEN)
    bytes_accessed = (x_fm.size * 4 + b_pad * 4
                      + sum(int(a.size) * a.dtype.itemsize
                            for a in (w1, b1, w2, b2, w3, b3, w4, b4)))
    cost = pl.CostEstimate(flops=flops, transcendentals=b_pad,
                           bytes_accessed=bytes_accessed)

    # Scoped-VMEM limit: live (128, TB) f32/bf16 temporaries + double-buffered
    # x/out tiles + resident weights. Raise above the 16/32 MiB defaults when
    # tiles are large, but stay well under v7x's 64 MiB physical VMEM.
    act_bytes = HIDDEN * tile_b_eff * 4
    vmem_limit = int(min(48 * 2**20, max(32 * 2**20, 12 * act_bytes)))

    out_fm = pl.pallas_call(
        generator_kernel,
        out_shape=jax.ShapeDtypeStruct((1, b_pad), jnp.float32),
        grid_spec=pltpu.PrefetchScalarGridSpec(
            num_scalar_prefetch=0,
            grid=(n_tiles,),
            in_specs=[
                pl.BlockSpec((1, tile_b_eff), lambda i: (0, i)),    # x (lane-dense)
                const_block(w1), const_block(b1),
                const_block(w2), const_block(b2),
                const_block(w3), const_block(b3),
                const_block(w4),
                pl.BlockSpec(memory_space=pltpu.MemorySpace.SMEM),  # scalar b4
            ],
            out_specs=pl.BlockSpec((1, tile_b_eff), lambda i: (0, i)),
        ),
        compiler_params=pltpu.CompilerParams(
            dimension_semantics=("parallel",),   # multi-tile grids use both v7x TCs
            vmem_limit_bytes=vmem_limit),
        cost_estimate=cost,
    )(x_fm, w1, b1, w2, b2, w3, b3, w4, b4)

    return out_fm[0, :B].reshape(B, 1)


def init_params(key):
    """Deterministic synthetic init matching the PyTorch module's shapes.

    Hidden-layer weights are kept in PyTorch (out, in) layout (feature-major
    kernel computes W @ h + b); biases are stored as (out, 1) columns. The
    final layer's weight is stored as a (128, 1) column (transpose of the
    PyTorch (1, 128) weight) and its bias as a (1, 1) scalar. All f32.
    """
    keys = jax.random.split(key, 8)

    def linear(kw, kb, fan_in, fan_out):
        bound = 1.0 / jnp.sqrt(jnp.float32(fan_in))
        w = jax.random.uniform(kw, (fan_out, fan_in), jnp.float32, -bound, bound)
        b = jax.random.uniform(kb, (fan_out, 1), jnp.float32, -bound, bound)
        return w, b

    w1, b1 = linear(keys[0], keys[1], 1, HIDDEN)        # (128, 1),   (128, 1)
    w2, b2 = linear(keys[2], keys[3], HIDDEN, HIDDEN)   # (128, 128), (128, 1)
    w3, b3 = linear(keys[4], keys[5], HIDDEN, HIDDEN)   # (128, 128), (128, 1)
    w4t, b4 = linear(keys[6], keys[7], HIDDEN, 1)       # (1, 128),   (1, 1)
    return {"w1": w1, "b1": b1, "w2": w2, "b2": b2,
            "w3": w3, "b3": b3, "w4": w4t.T, "b4": b4}


def reference_forward(x, p):
    """Pure-JAX f32 batch-major reference matching nn.Linear semantics."""
    h = _leaky_relu(x @ p["w1"].T + p["b1"].T)
    h = _leaky_relu(h @ p["w2"].T + p["b2"].T)
    h = _leaky_relu(h @ p["w3"].T + p["b3"].T)
    return jnp.tanh(h @ p["w4"] + p["b4"])


if __name__ == "__main__":
    key = jax.random.PRNGKey(0)
    pkey, xkey = jax.random.split(key)

    params = init_params(pkey)

    batch = 16  # noise z ~ N(0, 1), shape (batch, 1); padded to one 256-wide tile
    x = jax.random.normal(xkey, (batch, 1), dtype=jnp.float32)

    out = generator_forward(x, params)
    out = jax.block_until_ready(out)

    ref = reference_forward(x, params)
    assert out.shape == (batch, 1)
    # Kernel uses bf16 MXU matmuls (f32 accumulate); compare against the f32
    # reference with a correspondingly loosened tolerance.
    assert jnp.allclose(out, ref, atol=5e-2, rtol=5e-2), "mismatch vs reference"

    print("KERNEL_OK")
</pallas_src>

<mosaic_0001>
module attributes {stable_mosaic.version = 11 : i64} {
  func.func @generator_kernel(%arg0: i32, %arg1: memref<1x256xf32, #tpu.memory_space<vmem>>, %arg2: memref<128x1xf32, #tpu.memory_space<vmem>>, %arg3: memref<128x1xf32, #tpu.memory_space<vmem>>, %arg4: memref<128x128xbf16, #tpu.memory_space<vmem>>, %arg5: memref<128x1xf32, #tpu.memory_space<vmem>>, %arg6: memref<128x128xbf16, #tpu.memory_space<vmem>>, %arg7: memref<128x1xf32, #tpu.memory_space<vmem>>, %arg8: memref<128x1xf32, #tpu.memory_space<vmem>>, %arg9: memref<1x1xf32, #tpu.memory_space<smem>>, %arg10: memref<1x256xf32, #tpu.memory_space<vmem>>) attributes {dimension_semantics = [#tpu.dimension_semantics<parallel>], iteration_bounds = array<i64: 1>, scalar_prefetch = 0 : i64, scratch_operands = 0 : i64, tpu.core_type = #tpu.core_type<tc>, window_params = [{transform_indices = @transform_0, window_bounds = array<i64: 1, 256>}, {pipeline_mode = #tpu.pipeline_mode<synchronous>, transform_indices = @transform_1, window_bounds = array<i64: 128, 1>}, {pipeline_mode = #tpu.pipeline_mode<synchronous>, transform_indices = @transform_2, window_bounds = array<i64: 128, 1>}, {pipeline_mode = #tpu.pipeline_mode<synchronous>, transform_indices = @transform_3, window_bounds = array<i64: 128, 128>}, {pipeline_mode = #tpu.pipeline_mode<synchronous>, transform_indices = @transform_4, window_bounds = array<i64: 128, 1>}, {pipeline_mode = #tpu.pipeline_mode<synchronous>, transform_indices = @transform_5, window_bounds = array<i64: 128, 128>}, {pipeline_mode = #tpu.pipeline_mode<synchronous>, transform_indices = @transform_6, window_bounds = array<i64: 128, 1>}, {pipeline_mode = #tpu.pipeline_mode<synchronous>, transform_indices = @transform_7, window_bounds = array<i64: 128, 1>}, {transform_indices = @transform_8, window_bounds = array<i64: 1, 1>}, {transform_indices = @transform_9, window_bounds = array<i64: 1, 256>}]} {
    %c0 = arith.constant 0 : index
    %c0_0 = arith.constant 0 : index
    %0 = vector.load %arg1[%c0, %c0_0] : memref<1x256xf32, #tpu.memory_space<vmem>>, vector<1x256xf32>
    %c0_1 = arith.constant 0 : index
    %c0_2 = arith.constant 0 : index
    %1 = vector.load %arg2[%c0_1, %c0_2] : memref<128x1xf32, #tpu.memory_space<vmem>>, vector<128x1xf32>
    %2 = vector.broadcast %1 : vector<128x1xf32> to vector<128x256xf32>
    %3 = vector.broadcast %0 : vector<1x256xf32> to vector<128x256xf32>
    %4 = arith.mulf %2, %3 : vector<128x256xf32>
    %c0_3 = arith.constant 0 : index
    %c0_4 = arith.constant 0 : index
    %5 = vector.load %arg3[%c0_3, %c0_4] : memref<128x1xf32, #tpu.memory_space<vmem>>, vector<128x1xf32>
    %6 = vector.broadcast %5 : vector<128x1xf32> to vector<128x256xf32>
    %7 = arith.addf %4, %6 : vector<128x256xf32>
    %cst = arith.constant 2.000000e-02 : f32
    %8 = vector.broadcast %cst : f32 to vector<128x256xf32>
    %9 = arith.mulf %8, %7 : vector<128x256xf32>
    %10 = arith.maximumf %7, %9 : vector<128x256xf32>
    %c0_5 = arith.constant 0 : index
    %c0_6 = arith.constant 0 : index
    %11 = vector.load %arg4[%c0_5, %c0_6] : memref<128x128xbf16, #tpu.memory_space<vmem>>, vector<128x128xbf16>
    %12 = arith.truncf %10 : vector<128x256xf32> to vector<128x256xbf16>
    %cst_7 = arith.constant dense<0.000000e+00> : vector<128x256xf32>
    %13 = tpu.matmul %11, %12, %cst_7 {dimension_numbers = #tpu.dot_dimension_numbers<[1], [0], [0], [1], [0, 0, 1, 1], [], []>} : vector<128x128xbf16>, vector<128x256xbf16>, vector<128x256xf32> -> vector<128x256xf32>
    %c0_8 = arith.constant 0 : index
    %c0_9 = arith.constant 0 : index
    %14 = vector.load %arg5[%c0_8, %c0_9] : memref<128x1xf32, #tpu.memory_space<vmem>>, vector<128x1xf32>
    %15 = vector.broadcast %14 : vector<128x1xf32> to vector<128x256xf32>
    %16 = arith.addf %13, %15 : vector<128x256xf32>
    %cst_10 = arith.constant 2.000000e-02 : f32
    %17 = vector.broadcast %cst_10 : f32 to vector<128x256xf32>
    %18 = arith.mulf %17, %16 : vector<128x256xf32>
    %19 = arith.maximumf %16, %18 : vector<128x256xf32>
    %c0_11 = arith.constant 0 : index
    %c0_12 = arith.constant 0 : index
    %20 = vector.load %arg6[%c0_11, %c0_12] : memref<128x128xbf16, #tpu.memory_space<vmem>>, vector<128x128xbf16>
    %21 = arith.truncf %19 : vector<128x256xf32> to vector<128x256xbf16>
    %cst_13 = arith.constant dense<0.000000e+00> : vector<128x256xf32>
    %22 = tpu.matmul %20, %21, %cst_13 {dimension_numbers = #tpu.dot_dimension_numbers<[1], [0], [0], [1], [0, 0, 1, 1], [], []>} : vector<128x128xbf16>, vector<128x256xbf16>, vector<128x256xf32> -> vector<128x256xf32>
    %c0_14 = arith.constant 0 : index
    %c0_15 = arith.constant 0 : index
    %23 = vector.load %arg7[%c0_14, %c0_15] : memref<128x1xf32, #tpu.memory_space<vmem>>, vector<128x1xf32>
    %24 = vector.broadcast %23 : vector<128x1xf32> to vector<128x256xf32>
    %25 = arith.addf %22, %24 : vector<128x256xf32>
    %cst_16 = arith.constant 2.000000e-02 : f32
    %26 = vector.broadcast %cst_16 : f32 to vector<128x256xf32>
    %27 = arith.mulf %26, %25 : vector<128x256xf32>
    %28 = arith.maximumf %25, %27 : vector<128x256xf32>
    %c0_17 = arith.constant 0 : index
    %c0_18 = arith.constant 0 : index
    %29 = vector.load %arg8[%c0_17, %c0_18] : memref<128x1xf32, #tpu.memory_space<vmem>>, vector<128x1xf32>
    %30 = vector.broadcast %29 : vector<128x1xf32> to vector<128x256xf32>
    %31 = arith.mulf %30, %28 : vector<128x256xf32>
    %cst_19 = arith.constant dense<0.000000e+00> : vector<256xf32>
    %32 = vector.multi_reduction <add>, %31, %cst_19 [0] : vector<128x256xf32> to vector<256xf32>
    %33 = vector.shape_cast %32 : vector<256xf32> to vector<1x256xf32>
    %c0_20 = arith.constant 0 : index
    %c0_21 = arith.constant 0 : index
    %34 = memref.load %arg9[%c0_20, %c0_21] : memref<1x1xf32, #tpu.memory_space<smem>>
    %35 = vector.broadcast %34 : f32 to vector<1x256xf32>
    %36 = arith.addf %33, %35 : vector<1x256xf32>
    %37 = math.tanh %36 : vector<1x256xf32>
    %c0_22 = arith.constant 0 : index
    %c0_23 = arith.constant 0 : index
    %38 = vector.load %arg10[%c0_22, %c0_23] : memref<1x256xf32, #tpu.memory_space<vmem>>, vector<1x256xf32>
    tpu.vector_store %arg10[%c0_22, %c0_23], %37 {strides = array<i32>} : memref<1x256xf32, #tpu.memory_space<vmem>>, vector<1x256xf32>,
    return
  }
  func.func @transform_0(%arg0: i32) -> (i32, i32) {
    %c0_i32 = arith.constant 0 : i32
    %c0_i32_0 = arith.constant 0 : i32
    return %c0_i32, %arg0 : i32, i32
  }
  func.func @transform_1(%arg0: i32) -> (i32, i32) {
    %c0_i32 = arith.constant 0 : i32
    %c0_i32_0 = arith.constant 0 : i32
    %c0_i32_1 = arith.constant 0 : i32
    return %c0_i32, %c0_i32_0 : i32, i32
  }
  func.func @transform_2(%arg0: i32) -> (i32, i32) {
    %c0_i32 = arith.constant 0 : i32
    %c0_i32_0 = arith.constant 0 : i32
    %c0_i32_1 = arith.constant 0 : i32
    return %c0_i32, %c0_i32_0 : i32, i32
  }
  func.func @transform_3(%arg0: i32) -> (i32, i32) {
    %c0_i32 = arith.constant 0 : i32
    %c0_i32_0 = arith.constant 0 : i32
    %c0_i32_1 = arith.constant 0 : i32
    return %c0_i32, %c0_i32_0 : i32, i32
  }
  func.func @transform_4(%arg0: i32) -> (i32, i32) {
    %c0_i32 = arith.constant 0 : i32
    %c0_i32_0 = arith.constant 0 : i32
    %c0_i32_1 = arith.constant 0 : i32
    return %c0_i32, %c0_i32_0 : i32, i32
  }
  func.func @transform_5(%arg0: i32) -> (i32, i32) {
    %c0_i32 = arith.constant 0 : i32
    %c0_i32_0 = arith.constant 0 : i32
    %c0_i32_1 = arith.constant 0 : i32
    return %c0_i32, %c0_i32_0 : i32, i32
  }
  func.func @transform_6(%arg0: i32) -> (i32, i32) {
    %c0_i32 = arith.constant 0 : i32
    %c0_i32_0 = arith.constant 0 : i32
    %c0_i32_1 = arith.constant 0 : i32
    return %c0_i32, %c0_i32_0 : i32, i32
  }
  func.func @transform_7(%arg0: i32) -> (i32, i32) {
    %c0_i32 = arith.constant 0 : i32
    %c0_i32_0 = arith.constant 0 : i32
    %c0_i32_1 = arith.constant 0 : i32
    return %c0_i32, %c0_i32_0 : i32, i32
  }
  func.func @transform_8(%arg0: i32) -> (i32, i32) {
    %c0_i32 = arith.constant 0 : i32
    %c0_i32_0 = arith.constant 0 : i32
    %c0_i32_1 = arith.constant 0 : i32
    return %c0_i32, %c0_i32_0 : i32, i32
  }
  func.func @transform_9(%arg0: i32) -> (i32, i32) {
    %c0_i32 = arith.constant 0 : i32
    %c0_i32_0 = arith.constant 0 : i32
    return %c0_i32, %arg0 : i32, i32
  }
}

</mosaic_0001>

<bundles_post_ra>
// kernel: tpu_custom_call.1
= control target key start
LH: loop header
LB: loop body
LE: loop exit
PB: predicated region body
PF: predicated region fallthrough
CT: control target
= control target key end

     0   :  { %v1349_v2 = vmov 0   ;;  %s1921_s0 = inlined_call_operand.vmem [shape: f32[1,256], index: 0, kind: input, shape index: {}]   ;;  %s1922_s1 = inlined_call_operand.vmem [shape: f32[128,1], index: 1, kind: input, shape index: {}]   ;;  %s1923_s2 = inlined_call_operand.vmem [shape: f32[128,1], index: 2, kind: input, shape index: {}]   ;;  %s1924_s3 = inlined_call_operand.vmem [shape: bf16[128,128], index: 3, kind: input, shape index: {}]   ;;  %s1925_s4 = inlined_call_operand.vmem [shape: f32[128,1], index: 4, kind: input, shape index: {}]   ;;  %s1926_s5 = inlined_call_operand.vmem [shape: bf16[128,128], index: 5, kind: input, shape index: {}]   ;;  %s1927_s6 = inlined_call_operand.vmem [shape: f32[128,1], index: 6, kind: input, shape index: {}]   ;;  %s1928_s7 = inlined_call_operand.vmem [shape: f32[128,1], index: 7, kind: input, shape index: {}]   ;;  %s1929_s8 = inlined_call_operand.<no memory space> [shape: f32[1,1], index: 8, kind: input, shape index: {}]   ;;  %s1930_s9 = inlined_call_operand.hbm [shape: f32[1,256], index: 9, kind: output, shape index: {}]  }
   0x1   :  { %v189_v0 = vld [vmem:[%s1923_s2 + $0x70] sm:$0xff]  ;;  %1306 = vset.pattern.permute.xlu1 %v1349_v2  ;;  %1305 = vset.pattern.permute.xlu0 %v1349_v2  ;;  %v190_v3 = vld [vmem:[%s1923_s2 + $0x78] sm:$0xff]  ;;  %v49_v5 = vld [vmem:[%s1922_s1 + $0x68] sm:$0xff] }
   0x2   :  { %v50_v1 = vld [vmem:[%s1922_s1 + $0x70] sm:$0xff]  ;;  %263 = vperm.xlu1 %1306, %v189_v0   ;;  %v51_v4 = vld [vmem:[%s1922_s1 + $0x78] sm:$0xff]  ;;  %575 = vmatprep.mubr.bf16.mxu0 %v1349_v2  ;;  %v48_v6 = vld [vmem:[%s1922_s1 + $0x60] sm:$0xff] }
   0x3   :  { %124 = vperm.xlu0 %1305, %v50_v1   ;;  %928 = vmatprep.mubr.bf16.mxu1 %v1349_v2  ;;  %v188_v7 = vld [vmem:[%s1923_s2 + $0x68] sm:$0xff]  ;;  %v187_v8 = vld [vmem:[%s1923_s2 + $0x60] sm:$0xff]  ;;  %v47_v9 = vld [vmem:[%s1922_s1 + $0x58] sm:$0xff] }
   0x4   :  { %v46_v10 = vld [vmem:[%s1922_s1 + $0x50] sm:$0xff]  ;;  %v186_v11 = vld [vmem:[%s1923_s2 + $0x58] sm:$0xff]  ;;  %v45_v13 = vld [vmem:[%s1922_s1 + $0x48] sm:$0xff] }
   0x5   :  { %v185_v12 = vld [vmem:[%s1923_s2 + $0x50] sm:$0xff]  ;;  %v44_v14 = vld [vmem:[%s1922_s1 + $0x40] sm:$0xff]  ;;  %v184_v15 = vld [vmem:[%s1923_s2 + $0x48] sm:$0xff] }
   0x6   :  { %268 = vperm.xlu1 %1306, %v190_v3   ;;  %v183_v16 = vld [vmem:[%s1923_s2 + $0x40] sm:$0xff]  ;;  %v43_v17 = vld [vmem:[%s1922_s1 + $0x38] sm:$0xff]  ;;  %v42_v18 = vld [vmem:[%s1922_s1 + $0x30] sm:$0xff] }
   0x7   :  { %129 = vperm.xlu0 %1305, %v51_v4   ;;  %v182_v19 = vld [vmem:[%s1923_s2 + $0x38] sm:$0xff]  ;;  %v181_v20 = vld [vmem:[%s1923_s2 + $0x30] sm:$0xff] }
   0xa   :  { %119 = vperm.xlu1 %1306, %v49_v5  }
   0xb   :  { %114 = vperm.xlu0 %1305, %v48_v6  }
   0xe   :  { %258 = vperm.xlu1 %1306, %v188_v7  }
   0xf   :  { %253 = vperm.xlu0 %1305, %v187_v8  }
  0x12   :  { %109 = vperm.xlu1 %1306, %v47_v9  }
  0x13   :  { %104 = vperm.xlu0 %1305, %v46_v10  }
  0x16   :  { %248 = vperm.xlu1 %1306, %v186_v11  }
  0x17   :  { %243 = vperm.xlu0 %1305, %v185_v12  }
  0x1a   :  { %99 = vperm.xlu1 %1306, %v45_v13  }
  0x1b   :  { %94 = vperm.xlu0 %1305, %v44_v14  }
  0x1e   :  { %238 = vperm.xlu1 %1306, %v184_v15  }
  0x1f   :  { %233 = vperm.xlu0 %1305, %v183_v16  }
  0x22   :  { %89 = vperm.xlu1 %1306, %v43_v17  }
  0x23   :  { %84 = vperm.xlu0 %1305, %v42_v18  }
  0x24   :  { %15 = vsyncpa [#allocation4], 0  ;;  %v41_v21 = vld [vmem:[%s1922_s1 + $0x28] sm:$0xff]  ;;  %v40_v22 = vld [vmem:[%s1922_s1 + $0x20] sm:$0xff]  ;;  %v133_v57 = vlaneseq }
  0x25   :  { %v180_v23 = vld [vmem:[%s1923_s2 + $0x28] sm:$0xff]  ;;  %v179_v24 = vld [vmem:[%s1923_s2 + $0x20] sm:$0xff]  ;;  %v39_v25 = vld [vmem:[%s1922_s1 + $0x18] sm:$0xff] }
  0x26   :  { %228 = vperm.xlu1 %1306, %v182_v19   ;;  %v38_v26 = vld [vmem:[%s1922_s1 + $0x10] sm:$0xff]  ;;  %v178_v27 = vld [vmem:[%s1923_s2 + $0x18] sm:$0xff]  ;;  %v37_v29 = vld [vmem:[%s1922_s1 + $0x8] sm:$0xff]  ;;  %v1581_v60 = vshrl.u32 %v133_v57, 7  ;;  %vm1269_vm0 = vcmp.lt.s32.totalorder %v133_v57, 256 }
  0x27   :  { %223 = vperm.xlu0 %1305, %v181_v20   ;;  %v177_v28 = vld [vmem:[%s1923_s2 + $0x10] sm:$0xff]  ;;  %v36_v30 = vld [vmem:[%s1922_s1] sm:$0xff]  ;;  %v176_v31 = vld [vmem:[%s1923_s2 + $0x8] sm:$0xff]  ;;  %s1351_s1 = smov [#allocation3]  }
  0x28   :  { %v175_v32 = vld [vmem:[%s1923_s2] sm:$0xff]  ;;  %v414_v33 = vld [vmem:[%s1925_s4 + $0x78] sm:$0xff]  ;;  %v413_v34 = vld [vmem:[%s1925_s4 + $0x70] sm:$0xff]  ;;  %v135_v63 = vsub.s32 0, %v1581_v60  ;;  %v139_v0 = vsub.s32 1, %v1581_v60  ;;  %s1278_s14 = sshll.u32 %s1351_s1, 4  ;;  %s1279_s14 = int_to_ptr.vmem [resolvable:$true] %s1278_s14 }
  0x29   :  { %v412_v35 = vld [vmem:[%s1925_s4 + $0x68] sm:$0xff]  ;;  %v411_v36 = vld [vmem:[%s1925_s4 + $0x60] sm:$0xff]  ;;  %v410_v37 = vld [vmem:[%s1925_s4 + $0x58] sm:$0xff]  ;;  %p1332_p1 = scmp.lt.s32.totalorder %s1279_s14, %s1279_s14 }
  0x2a   :  { %79 = vperm.xlu1 %1306, %v41_v21   ;;  %v409_v38 = vld [vmem:[%s1925_s4 + $0x50] sm:$0xff]  ;;  %v408_v39 = vld [vmem:[%s1925_s4 + $0x48] sm:$0xff]  ;;  %v407_v40 = vld [vmem:[%s1925_s4 + $0x40] sm:$0xff] }
  0x2b   :  { %74 = vperm.xlu0 %1305, %v40_v22   ;;  %v406_v41 = vld [vmem:[%s1925_s4 + $0x38] sm:$0xff]  ;;  %v405_v42 = vld [vmem:[%s1925_s4 + $0x30] sm:$0xff]  ;;  %v404_v43 = vld [vmem:[%s1925_s4 + $0x28] sm:$0xff] }
  0x2c   :  { %v403_v44 = vld [vmem:[%s1925_s4 + $0x20] sm:$0xff]  ;;  %v402_v45 = vld [vmem:[%s1925_s4 + $0x18] sm:$0xff]  ;;  %v401_v46 = vld [vmem:[%s1925_s4 + $0x10] sm:$0xff] }
  0x2d   :  { %v400_v47 = vld [vmem:[%s1925_s4 + $0x8] sm:$0xff]  ;;  %v399_v48 = vld [vmem:[%s1925_s4] sm:$0xff]  ;;  %v755_v51 = vld [vmem:[%s1927_s6 + $0x18] sm:$0xff] }
  0x2e   :  { %218 = vperm.xlu1 %1306, %v180_v23   ;;  %v753_v49 = vld [vmem:[%s1927_s6 + $0x8] sm:$0xff]  ;;  %v752_v50 = vld [vmem:[%s1927_s6] sm:$0xff]  ;;  %v754_v52 = vld [vmem:[%s1927_s6 + $0x10] sm:$0xff] }
  0x2f   :  { %213 = vperm.xlu0 %1305, %v179_v24   ;;  %v1073_v53 = vld [vmem:[%s1928_s7] sm:$0xff]  ;;  %v757_v55 = vld [vmem:[%s1927_s6 + $0x28] sm:$0xff]  ;;  %v758_v58 = vld [vmem:[%s1927_s6 + $0x30] sm:$0xff] }
  0x30   :  { %v756_v54 = vld [vmem:[%s1927_s6 + $0x20] sm:$0xff]  ;;  %v1074_v56 = vld [vmem:[%s1928_s7 + $0x8] sm:$0xff]  ;;  %v1075_v59 = vld [vmem:[%s1928_s7 + $0x10] sm:$0xff] }
  0x31   :  { %v759_v61 = vld [vmem:[%s1927_s6 + $0x38] sm:$0xff]  ;;  %v760_v1 = vld [vmem:[%s1927_s6 + $0x40] sm:$0xff]  ;;  %v761_v7 = vld [vmem:[%s1927_s6 + $0x48] sm:$0xff] }
  0x32   :  { %69 = vperm.xlu1 %1306, %v39_v25   ;;  %v1076_v62 = vld [vmem:[%s1928_s7 + $0x18] sm:$0xff]  ;;  %v1077_v3 = vld [vmem:[%s1928_s7 + $0x20] sm:$0xff]  ;;  %v1078_v8 = vld [vmem:[%s1928_s7 + $0x28] sm:$0xff] }
  0x33   :  { %64 = vperm.xlu0 %1305, %v38_v26   ;;  %v35_v4 = vld [vmem:[%s1921_s0] sm:$0x3]  ;;  %v762_v13 = vld [vmem:[%s1927_s6 + $0x50] sm:$0xff]  ;;  %v763_v21 = vld [vmem:[%s1927_s6 + $0x58] sm:$0xff] }
  0x34   :  { %v1600_v5 = vrot.slane %v35_v4, %v135_v63  ;;  %v1602_v6 = vrot.slane %v35_v4, %v139_v0  ;;  %v1079_v14 = vld [vmem:[%s1928_s7 + $0x30] sm:$0xff]  ;;  %v1080_v24 = vld [vmem:[%s1928_s7 + $0x38] sm:$0xff] }
  0x35   :  { %v766_v4 = vld [vmem:[%s1927_s6 + $0x70] sm:$0xff] }
  0x36   :  { %208 = vperm.xlu1 %1306, %v178_v27  }
  0x37   :  { %203 = vperm.xlu0 %1305, %v177_v28  }
  0x3a   :  { %59 = vperm.xlu1 %1306, %v37_v29   ;;  %v764_v29 = vld [vmem:[%s1927_s6 + $0x60] sm:$0xff] }
  0x3b   :  { %54 = vperm.xlu0 %1305, %v36_v30  }
  0x3e   :  { %198 = vperm.xlu1 %1306, %v176_v31  }
  0x3f   :  { %193 = vperm.xlu0 %1305, %v175_v32  }
  0x42   :  { %492 = vperm.xlu1 %1306, %v414_v33  }
  0x43   :  { %487 = vperm.xlu0 %1305, %v413_v34  }
  0x46   :  { %482 = vperm.xlu1 %1306, %v412_v35  }
  0x47   :  { %477 = vperm.xlu0 %1305, %v411_v36   ;;  %v1081_v36 = vld [vmem:[%s1928_s7 + $0x40] sm:$0xff] }
  0x4a   :  { %472 = vperm.xlu1 %1306, %v410_v37  }
  0x4b   :  { %467 = vperm.xlu0 %1305, %v409_v38  }
  0x4e   :  { %462 = vperm.xlu1 %1306, %v408_v39  }
  0x4f   :  { %457 = vperm.xlu0 %1305, %v407_v40  }
  0x52   :  { %452 = vperm.xlu1 %1306, %v406_v41  }
  0x53   :  { %447 = vperm.xlu0 %1305, %v405_v42  }
  0x56   :  { %442 = vperm.xlu1 %1306, %v404_v43  }
  0x57   :  { %437 = vperm.xlu0 %1305, %v403_v44  }
  0x5a   :  { %432 = vperm.xlu1 %1306, %v402_v45  }
  0x5b   :  { %427 = vperm.xlu0 %1305, %v401_v46  }
  0x5e   :  { %422 = vperm.xlu1 %1306, %v400_v47  }
  0x5f   :  { %417 = vperm.xlu0 %1305, %v399_v48  }
  0x62   :  { %775 = vperm.xlu1 %1306, %v753_v49   ;;  %v765_v49 = vld [vmem:[%s1927_s6 + $0x68] sm:$0xff] }
  0x63   :  { %770 = vperm.xlu0 %1305, %v752_v50  }
  0x66   :  { %785 = vperm.xlu1 %1306, %v755_v51  }
  0x67   :  { %780 = vperm.xlu0 %1305, %v754_v52  }
  0x6a   :  { %1091 = vperm.xlu1 %1306, %v1073_v53  }
  0x6b   :  { %790 = vperm.xlu0 %1305, %v756_v54  }
  0x6e   :  { %795 = vperm.xlu1 %1306, %v757_v55  }
  0x6f   :  { %1096 = vperm.xlu0 %1305, %v1074_v56   ;;  %v1082_v56 = vld [vmem:[%s1928_s7 + $0x48] sm:$0xff] }
  0x72   :  { %800 = vperm.xlu1 %1306, %v758_v58  }
  0x73   :  { %1101 = vperm.xlu0 %1305, %v1075_v59  }
  0x76   :  { %805 = vperm.xlu1 %1306, %v759_v61  }
  0x77   :  { %1106 = vperm.xlu0 %1305, %v1076_v62  }
  0x7a   :  { %810 = vperm.xlu1 %1306, %v760_v1  }
  0x7b   :  { %1111 = vperm.xlu0 %1305, %v1077_v3  }
  0x7d   :  { %v264_v9 = vpop.permute.xlu1 %263 }
  0x7e   :  { %v125_v10 = vpop.permute.xlu0 %124  ;;  %815 = vperm.xlu1 %1306, %v761_v7  }
  0x7f   :  { %v171_v11 = vmul.f32 %v1600_v5, %v125_v10  ;;  %v172_v12 = vmul.f32 %v1602_v6, %v125_v10  ;;  %1116 = vperm.xlu0 %1305, %v1078_v8   ;;  %v1083_v10 = vld [vmem:[%s1928_s7 + $0x50] sm:$0xff] }
  0x81   :  { %v299_v15 = vadd.f32 %v264_v9, %v171_v11  ;;  %v300_v16 = vadd.f32 %v264_v9, %v172_v12  ;;  %v269_v17 = vpop.permute.xlu1 %268 }
  0x82   :  { %v130_v18 = vpop.permute.xlu0 %129  ;;  %820 = vperm.xlu1 %1306, %v762_v13  }
  0x83   :  { %v173_v19 = vmul.f32 %v1600_v5, %v130_v18  ;;  %v174_v20 = vmul.f32 %v1602_v6, %v130_v18  ;;  %1121 = vperm.xlu0 %1305, %v1079_v14   ;;  %v332_v27 = vmul.f32 0.02, %v300_v16  ;;  %v331_v28 = vmul.f32 0.02, %v299_v15 }
  0x85   :  { %v301_v22 = vadd.f32 %v269_v17, %v173_v19  ;;  %v302_v23 = vadd.f32 %v269_v17, %v174_v20  ;;  %v120_v25 = vpop.permute.xlu1 %119  ;;  %v364_v39 = vmax.f32 %v300_v16, %v332_v27  ;;  %v363_v41 = vmax.f32 %v299_v15, %v331_v28  ;;  %v767_v16 = vld [vmem:[%s1927_s6 + $0x78] sm:$0xff] }
  0x86   :  { %v115_v26 = vpop.permute.xlu0 %114  ;;  %825 = vperm.xlu1 %1306, %v763_v21   ;;  %v169_v32 = vmul.f32 %v1600_v5, %v120_v25  ;;  %v170_v33 = vmul.f32 %v1602_v6, %v120_v25 }
  0x87   :  { %1126 = vperm.xlu0 %1305, %v1080_v24   ;;  %v334_v30 = vmul.f32 0.02, %v302_v23  ;;  %v333_v31 = vmul.f32 0.02, %v301_v22  ;;  %v167_v34 = vmul.f32 %v1600_v5, %v115_v26  ;;  %v168_v35 = vmul.f32 %v1602_v6, %v115_v26 }
  0x89   :  { %v259_v37 = vpop.permute.xlu1 %258  ;;  %v366_v40 = vmax.f32 %v302_v23, %v334_v30  ;;  %v365_v42 = vmax.f32 %v301_v22, %v333_v31  ;;  %v1084_v23 = vld [vmem:[%s1928_s7 + $0x58] sm:$0xff] }
  0x8a   :  { %v254_v38 = vpop.permute.xlu0 %253  ;;  %v297_v43 = vadd.f32 %v259_v37, %v169_v32  ;;  %v298_v44 = vadd.f32 %v259_v37, %v170_v33  ;;  %830 = vperm.xlu1 %1306, %v764_v29   ;;  %v1086_v32 = vld [vmem:[%s1928_s7 + $0x68] sm:$0xff] }
  0x8b   :  { %v295_v45 = vadd.f32 %v254_v38, %v167_v34  ;;  %v296_v46 = vadd.f32 %v254_v38, %v168_v35  ;;  %1131 = vperm.xlu0 %1305, %v1081_v36   ;;  %v398_v47 = vpack.c.bf16 %v366_v40, %v364_v39  ;;  %v397_v48 = vpack.c.bf16 %v365_v42, %v363_v41  ;;  %v1085_v36 = vld [vmem:[%s1928_s7 + $0x60] sm:$0xff]  ;;  %v1088_v42 = vld [vmem:[%s1928_s7 + $0x78] sm:$0xff] }
  0x8c   :  { %v329_v50 = vmul.f32 0.02, %v297_v43  ;;  %v330_v51 = vmul.f32 0.02, %v298_v44 }
  0x8d   :  { %v327_v52 = vmul.f32 0.02, %v295_v45  ;;  %v328_v53 = vmul.f32 0.02, %v296_v46  ;;  %543 = vmatprep.subr.bf16.mxu0 %v398_v47  ;;  %v110_v54 = vpop.permute.xlu1 %109 }
  0x8e   :  { %v105_v55 = vpop.permute.xlu0 %104  ;;  %v361_v58 = vmax.f32 %v297_v43, %v329_v50  ;;  %v362_v59 = vmax.f32 %v298_v44, %v330_v51  ;;  %544 = vmatpush1.bf16.msra.mxu0 %v397_v48  ;;  %v165_v63 = vmul.f32 %v1600_v5, %v110_v54  ;;  %835 = vperm.xlu1 %1306, %v765_v49   ;;  %v1087_v49 = vld [vmem:[%s1928_s7 + $0x70] sm:$0xff] }
  0x8f   :  { %v359_v61 = vmax.f32 %v295_v45, %v327_v52  ;;  %v360_v62 = vmax.f32 %v296_v46, %v328_v53  ;;  %v166_v0 = vmul.f32 %v1602_v6, %v110_v54  ;;  %v163_v1 = vmul.f32 %v1600_v5, %v105_v55  ;;  %1136 = vperm.xlu0 %1305, %v1082_v56  }
  0x90   :  { %v164_v3 = vmul.f32 %v1602_v6, %v105_v55 }
  0x91   :  { %v395_v7 = vpack.c.bf16 %v361_v58, %v359_v61  ;;  %v249_v8 = vpop.permute.xlu1 %248  ;;  %v396_v11 = vpack.c.bf16 %v362_v59, %v360_v62 }
  0x92   :  { %v244_v9 = vpop.permute.xlu0 %243  ;;  %v293_v12 = vadd.f32 %v249_v8, %v165_v63  ;;  %v294_v13 = vadd.f32 %v249_v8, %v166_v0  ;;  %840 = vperm.xlu1 %1306, %v766_v4  }
  0x93   :  { %v291_v14 = vadd.f32 %v244_v9, %v163_v1  ;;  %v292_v15 = vadd.f32 %v244_v9, %v164_v3  ;;  %545 = vmatprep.subr.bf16.mxu0 %v396_v11  ;;  %1141 = vperm.xlu0 %1305, %v1083_v10  }
  0x94   :  { %v325_v17 = vmul.f32 0.02, %v293_v12  ;;  %v326_v18 = vmul.f32 0.02, %v294_v13  ;;  %546 = vmatpush1.bf16.msra.mxu0 %v395_v7 }
  0x95   :  { %v323_v19 = vmul.f32 0.02, %v291_v14  ;;  %v324_v20 = vmul.f32 0.02, %v292_v15  ;;  %v100_v21 = vpop.permute.xlu1 %99 }
  0x96   :  { %v95_v22 = vpop.permute.xlu0 %94  ;;  %v357_v24 = vmax.f32 %v293_v12, %v325_v17  ;;  %v358_v25 = vmax.f32 %v294_v13, %v326_v18  ;;  %v161_v28 = vmul.f32 %v1600_v5, %v100_v21  ;;  %845 = vperm.xlu1 %1306, %v767_v16   ;;  %v162_v29 = vmul.f32 %v1602_v6, %v100_v21 }
  0x97   :  { %v355_v26 = vmax.f32 %v291_v14, %v323_v19  ;;  %v356_v27 = vmax.f32 %v292_v15, %v324_v20  ;;  %v159_v30 = vmul.f32 %v1600_v5, %v95_v22  ;;  %v160_v31 = vmul.f32 %v1602_v6, %v95_v22  ;;  %1146 = vperm.xlu0 %1305, %v1084_v23  }
  0x99   :  { %v393_v33 = vpack.c.bf16 %v357_v24, %v355_v26  ;;  %v239_v34 = vpop.permute.xlu1 %238  ;;  %v394_v37 = vpack.c.bf16 %v358_v25, %v356_v27 }
  0x9a   :  { %v234_v35 = vpop.permute.xlu0 %233  ;;  %v289_v38 = vadd.f32 %v239_v34, %v161_v28  ;;  %v290_v39 = vadd.f32 %v239_v34, %v162_v29  ;;  %1156 = vperm.xlu1 %1306, %v1086_v32  }
  0x9b   :  { %v287_v40 = vadd.f32 %v234_v35, %v159_v30  ;;  %v288_v41 = vadd.f32 %v234_v35, %v160_v31  ;;  %547 = vmatprep.subr.bf16.mxu0 %v394_v37  ;;  %1151 = vperm.xlu0 %1305, %v1085_v36  }
  0x9c   :  { %v321_v43 = vmul.f32 0.02, %v289_v38  ;;  %v322_v44 = vmul.f32 0.02, %v290_v39  ;;  %548 = vmatpush1.bf16.msra.mxu0 %v393_v33 }
  0x9d   :  { %v319_v45 = vmul.f32 0.02, %v287_v40  ;;  %v320_v46 = vmul.f32 0.02, %v288_v41  ;;  %v90_v47 = vpop.permute.xlu1 %89 }
  0x9e   :  { %v85_v48 = vpop.permute.xlu0 %84  ;;  %v353_v50 = vmax.f32 %v289_v38, %v321_v43  ;;  %v354_v51 = vmax.f32 %v290_v39, %v322_v44  ;;  %v157_v54 = vmul.f32 %v1600_v5, %v90_v47  ;;  %1166 = vperm.xlu1 %1306, %v1088_v42   ;;  %v158_v55 = vmul.f32 %v1602_v6, %v90_v47 }
  0x9f   :  { %v351_v52 = vmax.f32 %v287_v40, %v319_v45  ;;  %v352_v53 = vmax.f32 %v288_v41, %v320_v46  ;;  %v155_v56 = vmul.f32 %v1600_v5, %v85_v48  ;;  %v156_v58 = vmul.f32 %v1602_v6, %v85_v48  ;;  %1161 = vperm.xlu0 %1305, %v1087_v49  }
  0xa1   :  { %v391_v59 = vpack.c.bf16 %v353_v50, %v351_v52  ;;  %v229_v61 = vpop.permute.xlu1 %228  ;;  %v392_v63 = vpack.c.bf16 %v354_v51, %v352_v53 }
  0xa2   :  { %v224_v62 = vpop.permute.xlu0 %223  ;;  %v285_v0 = vadd.f32 %v229_v61, %v157_v54  ;;  %v286_v1 = vadd.f32 %v229_v61, %v158_v55 }
  0xa3   :  { %v283_v3 = vadd.f32 %v224_v62, %v155_v56  ;;  %v284_v4 = vadd.f32 %v224_v62, %v156_v58  ;;  %549 = vmatprep.subr.bf16.mxu0 %v392_v63 }
  0xa4   :  { %v317_v7 = vmul.f32 0.02, %v285_v0  ;;  %v318_v8 = vmul.f32 0.02, %v286_v1  ;;  %550 = vmatpush1.bf16.msra.mxu0 %v391_v59 }
  0xa5   :  { %v315_v9 = vmul.f32 0.02, %v283_v3  ;;  %v316_v10 = vmul.f32 0.02, %v284_v4  ;;  %v80_v11 = vpop.permute.xlu1 %79 }
  0xa6   :  { %v75_v12 = vpop.permute.xlu0 %74  ;;  %v349_v13 = vmax.f32 %v285_v0, %v317_v7  ;;  %v350_v14 = vmax.f32 %v286_v1, %v318_v8  ;;  %v153_v17 = vmul.f32 %v1600_v5, %v80_v11  ;;  %v154_v18 = vmul.f32 %v1602_v6, %v80_v11 }
  0xa7   :  { %v347_v15 = vmax.f32 %v283_v3, %v315_v9  ;;  %v348_v16 = vmax.f32 %v284_v4, %v316_v10  ;;  %v151_v19 = vmul.f32 %v1600_v5, %v75_v12  ;;  %v152_v20 = vmul.f32 %v1602_v6, %v75_v12 }
  0xa9   :  { %v389_v21 = vpack.c.bf16 %v349_v13, %v347_v15  ;;  %v219_v22 = vpop.permute.xlu1 %218  ;;  %v390_v24 = vpack.c.bf16 %v350_v14, %v348_v16 }
  0xaa   :  { %v214_v23 = vpop.permute.xlu0 %213  ;;  %v281_v25 = vadd.f32 %v219_v22, %v153_v17  ;;  %v282_v26 = vadd.f32 %v219_v22, %v154_v18  ;;  %v1307_v22 = vld [vmem:[%s1924_s3] sm:$0xff]  }
  0xab   :  { %v279_v27 = vadd.f32 %v214_v23, %v151_v19  ;;  %v280_v28 = vadd.f32 %v214_v23, %v152_v20  ;;  %551 = vmatprep.subr.bf16.mxu0 %v390_v24  ;;  %v1308_v23 = vld [vmem:[%s1924_s3 + $0x8] sm:$0xff]   ;;  %v1309_v24 = vld [vmem:[%s1924_s3 + $0x10] sm:$0xff]  }
  0xac   :  { %v313_v29 = vmul.f32 0.02, %v281_v25  ;;  %v314_v30 = vmul.f32 0.02, %v282_v26  ;;  %552 = vmatpush1.bf16.msra.mxu0 %v389_v21 }
  0xad   :  { %v311_v31 = vmul.f32 0.02, %v279_v27  ;;  %v312_v32 = vmul.f32 0.02, %v280_v28  ;;  %v70_v33 = vpop.permute.xlu1 %69 }
  0xae   :  { %v65_v34 = vpop.permute.xlu0 %64  ;;  %v345_v35 = vmax.f32 %v281_v25, %v313_v29  ;;  %v346_v36 = vmax.f32 %v282_v26, %v314_v30  ;;  %v149_v39 = vmul.f32 %v1600_v5, %v70_v33  ;;  %v150_v40 = vmul.f32 %v1602_v6, %v70_v33  ;;  %v1310_v25 = vld [vmem:[%s1924_s3 + $0x18] sm:$0xff]   ;;  %v1311_v26 = vld [vmem:[%s1924_s3 + $0x20] sm:$0xff]  }
  0xaf   :  { %v343_v37 = vmax.f32 %v279_v27, %v311_v31  ;;  %v344_v38 = vmax.f32 %v280_v28, %v312_v32  ;;  %v147_v41 = vmul.f32 %v1600_v5, %v65_v34  ;;  %v148_v42 = vmul.f32 %v1602_v6, %v65_v34  ;;  %v1312_v27 = vld [vmem:[%s1924_s3 + $0x28] sm:$0xff]   ;;  %v1313_v28 = vld [vmem:[%s1924_s3 + $0x30] sm:$0xff]   ;;  %v1314_v29 = vld [vmem:[%s1924_s3 + $0x38] sm:$0xff]  }
  0xb1   :  { %v387_v43 = vpack.c.bf16 %v345_v35, %v343_v37  ;;  %v209_v44 = vpop.permute.xlu1 %208  ;;  %v388_v46 = vpack.c.bf16 %v346_v36, %v344_v38 }
  0xb2   :  { %v204_v45 = vpop.permute.xlu0 %203  ;;  %v277_v47 = vadd.f32 %v209_v44, %v149_v39  ;;  %v278_v48 = vadd.f32 %v209_v44, %v150_v40 }
  0xb3   :  { %v275_v49 = vadd.f32 %v204_v45, %v147_v41  ;;  %v276_v50 = vadd.f32 %v204_v45, %v148_v42  ;;  %553 = vmatprep.subr.bf16.mxu0 %v388_v46 }
  0xb4   :  { %v309_v51 = vmul.f32 0.02, %v277_v47  ;;  %v310_v52 = vmul.f32 0.02, %v278_v48  ;;  %554 = vmatpush1.bf16.msra.mxu0 %v387_v43 }
  0xb5   :  { %v307_v53 = vmul.f32 0.02, %v275_v49  ;;  %v308_v54 = vmul.f32 0.02, %v276_v50  ;;  %v60_v55 = vpop.permute.xlu1 %59 }
  0xb6   :  { %v55_v56 = vpop.permute.xlu0 %54  ;;  %v341_v58 = vmax.f32 %v277_v47, %v309_v51  ;;  %v342_v59 = vmax.f32 %v278_v48, %v310_v52  ;;  %v145_v63 = vmul.f32 %v1600_v5, %v60_v55  ;;  %v146_v0 = vmul.f32 %v1602_v6, %v60_v55 }
  0xb7   :  { %v339_v61 = vmax.f32 %v275_v49, %v307_v53  ;;  %v340_v62 = vmax.f32 %v276_v50, %v308_v54  ;;  %v143_v1 = vmul.f32 %v1600_v5, %v55_v56  ;;  %v144_v3 = vmul.f32 %v1602_v6, %v55_v56 }
  0xb9   :  { %v385_v4 = vpack.c.bf16 %v341_v58, %v339_v61  ;;  %v199_v7 = vpop.permute.xlu1 %198  ;;  %v386_v9 = vpack.c.bf16 %v342_v59, %v340_v62 }
  0xba   :  { %v194_v8 = vpop.permute.xlu0 %193  ;;  %v273_v10 = vadd.f32 %v199_v7, %v145_v63  ;;  %v274_v11 = vadd.f32 %v199_v7, %v146_v0 }
  0xbb   :  { %v271_v12 = vadd.f32 %v194_v8, %v143_v1  ;;  %v272_v13 = vadd.f32 %v194_v8, %v144_v3  ;;  %555 = vmatprep.subr.bf16.mxu0 %v386_v9 }
  0xbc   :  { %v305_v14 = vmul.f32 0.02, %v273_v10  ;;  %v306_v15 = vmul.f32 0.02, %v274_v11  ;;  %556 = vmatpush1.bf16.msra.mxu0 %v385_v4 }
  0xbd   :  { %v303_v16 = vmul.f32 0.02, %v271_v12  ;;  %v304_v17 = vmul.f32 0.02, %v272_v13  ;;  %v1723_v31 = vpop.permute.xlu1 %492 }
  0xbe   :  { %v337_v18 = vmax.f32 %v273_v10, %v305_v14  ;;  %v338_v19 = vmax.f32 %v274_v11, %v306_v15  ;;  %v1721_v30 = vpop.permute.xlu0 %487 }
  0xbf   :  { %v335_v20 = vmax.f32 %v271_v12, %v303_v16  ;;  %v336_v5 = vmax.f32 %v272_v13, %v304_v17 }
  0xc1   :  { %v383_v21 = vpack.c.bf16 %v337_v18, %v335_v20  ;;  %v384_v6 = vpack.c.bf16 %v338_v19, %v336_v5  ;;  %v1727_v33 = vpop.permute.xlu1 %482 }
  0xc2   :  { %v1725_v32 = vpop.permute.xlu0 %477 }
  0xc3   :  { %557 = vmatprep.subr.bf16.mxu0 %v384_v6 }
  0xc4   :  { %558 = vmatpush1.bf16.msra.mxu0 %v383_v21 }
  0xc5   :  { %v1731_v35 = vpop.permute.xlu1 %472 }
  0xc6   :  { %v1729_v34 = vpop.permute.xlu0 %467 }
  0xc7   :  { %576 = vmatmul.mubr.bf16.vlgmr.msra.gmra.mxu0 %v1307_v22 }
  0xc8   :  { %585 = vmatprep.mubr.bf16.mxu0 %v1349_v2 }
  0xc9   :  { %v1735_v37 = vpop.permute.xlu1 %462 }
  0xca   :  { %v1733_v36 = vpop.permute.xlu0 %457 }
  0xcd   :  { %v1739_v39 = vpop.permute.xlu1 %452 }
  0xce   :  { %v1737_v38 = vpop.permute.xlu0 %447 }
  0xcf   :  { %586 = vmatmul.mubr.bf16.gmra.mxu0 %v1308_v23 }
  0xd0   :  { %595 = vmatprep.mubr.bf16.mxu0 %v1349_v2 }
  0xd1   :  { %v1743_v41 = vpop.permute.xlu1 %442 }
  0xd2   :  { %v1741_v40 = vpop.permute.xlu0 %437 }
  0xd5   :  { %v433_v43 = vpop.permute.xlu1 %432 }
  0xd6   :  { %v428_v42 = vpop.permute.xlu0 %427 }
  0xd7   :  { %596 = vmatmul.mubr.bf16.gmra.mxu0 %v1309_v24 }
  0xd8   :  { %605 = vmatprep.mubr.bf16.mxu0 %v1349_v2 }
  0xd9   :  { %v423_v49 = vpop.permute.xlu1 %422 }
  0xda   :  { %v418_v44 = vpop.permute.xlu0 %417 }
  0xdf   :  { %606 = vmatmul.mubr.bf16.gmra.mxu0 %v1310_v25 }
  0xe0   :  { %615 = vmatprep.mubr.bf16.mxu0 %v1349_v2 }
  0xe7   :  { %616 = vmatmul.mubr.bf16.gmra.mxu0 %v1311_v26 }
  0xe8   :  { %625 = vmatprep.mubr.bf16.mxu0 %v1349_v2 }
  0xef   :  { %626 = vmatmul.mubr.bf16.gmra.mxu0 %v1312_v27 }
  0xf0   :  { %635 = vmatprep.mubr.bf16.mxu0 %v1349_v2 }
  0xf7   :  { %636 = vmatmul.mubr.bf16.gmra.mxu0 %v1313_v28 }
  0xf8   :  { %645 = vmatprep.mubr.bf16.mxu0 %v1349_v2 }
  0xff   :  { %646 = vmatmul.mubr.bf16.gmra.mxu0 %v1314_v29 }
 0x187   :  { %v577_v45 = vpop.f32.mrf.mxu0 }
 0x188   :  { %v578_v46 = vadd.f32 %v577_v45, %v418_v44 }
 0x189   :  { %v579_v47 = vpop.f32.mrf.mxu0 }
 0x18a   :  { %v580_v48 = vadd.f32 %v579_v47, %v418_v44  ;;  %v656_v51 = vmul.f32 0.02, %v578_v46 }
 0x18b   :  { %v581_v50 = vpop.f32.mrf.mxu0 }
 0x18c   :  { %v582_v52 = vadd.f32 %v581_v50, %v423_v49  ;;  %v657_v54 = vmul.f32 0.02, %v580_v48  ;;  %v688_v59 = vmax.f32 %v578_v46, %v656_v51 }
 0x18d   :  { %v583_v53 = vpop.f32.mrf.mxu0 }
 0x18e   :  { %v658_v55 = vmul.f32 0.02, %v582_v52  ;;  %v584_v56 = vadd.f32 %v583_v53, %v423_v49  ;;  %v689_v1 = vmax.f32 %v580_v48, %v657_v54 }
 0x18f   :  { %v587_v58 = vpop.f32.mrf.mxu0 }
 0x190   :  { %v690_v61 = vmax.f32 %v582_v52, %v658_v55  ;;  %v659_v62 = vmul.f32 0.02, %v584_v56  ;;  %v588_v63 = vadd.f32 %v587_v58, %v428_v42 }
 0x191   :  { %v589_v0 = vpop.f32.mrf.mxu0 }
 0x192   :  { %v691_v3 = vmax.f32 %v584_v56, %v659_v62  ;;  %v590_v4 = vadd.f32 %v589_v0, %v428_v42  ;;  %v1745_v7 = vpack.c.bf16 %v690_v61, %v688_v59  ;;  %v660_v9 = vmul.f32 0.02, %v588_v63 }
 0x193   :  { %v591_v8 = vpop.f32.mrf.mxu0 }
 0x194   :  { %v592_v10 = vadd.f32 %v591_v8, %v433_v43  ;;  %v1747_v11 = vpack.c.bf16 %v691_v3, %v689_v1  ;;  %v661_v13 = vmul.f32 0.02, %v590_v4  ;;  %v692_v17 = vmax.f32 %v588_v63, %v660_v9 }
 0x195   :  { %v593_v12 = vpop.f32.mrf.mxu0 }
 0x196   :  { %v662_v14 = vmul.f32 0.02, %v592_v10  ;;  %v594_v15 = vadd.f32 %v593_v12, %v433_v43  ;;  %v693_v5 = vmax.f32 %v590_v4, %v661_v13 }
 0x197   :  { %v1749_v16 = vpop.f32.mrf.mxu0 }
 0x198   :  { %v694_v18 = vmax.f32 %v592_v10, %v662_v14  ;;  %v663_v19 = vmul.f32 0.02, %v594_v15 }
 0x199   :  { %v1751_v20 = vpop.f32.mrf.mxu0 }
 0x19a   :  { %v695_v21 = vmax.f32 %v594_v15, %v663_v19  ;;  %v1753_v6 = vpack.c.bf16 %v694_v18, %v692_v17 }
 0x19b   :  { %v1755_v22 = vpop.f32.mrf.mxu0 }
 0x19c   :  { %v1757_v23 = vpack.c.bf16 %v695_v21, %v693_v5 }
 0x19d   :  { %v1759_v24 = vpop.f32.mrf.mxu0 }
 0x19f   :  { %v1761_v25 = vpop.f32.mrf.mxu0 }
 0x1a1   :  { %v1763_v26 = vpop.f32.mrf.mxu0 }
 0x1a3   :  { %v1765_v27 = vpop.f32.mrf.mxu0 }
 0x1a5   :  { %v613_v28 = vpop.f32.mrf.mxu0 }
 0x1a7   :  { %v617_v29 = vpop.f32.mrf.mxu0 }
 0x1a9   :  { %v619_v42 = vpop.f32.mrf.mxu0 }
 0x1ab   :  { %v621_v43 = vpop.f32.mrf.mxu0 }
 0x1ad   :  { %v623_v44 = vpop.f32.mrf.mxu0 }
 0x1ae   :  { %v624_v15 = vadd.f32 %v623_v44, %v1735_v37 }
 0x1af   :  { %v627_v45 = vpop.f32.mrf.mxu0 }
 0x1b1   :  { %v629_v46 = vpop.f32.mrf.mxu0 }
 0x1b3   :  { %v631_v47 = vpop.f32.mrf.mxu0 }
 0x1b4   :  { %v632_v17 = vadd.f32 %v631_v47, %v1731_v35  ;;  %v614_v47 = vadd.f32 %v613_v28, %v1739_v39 }
 0x1b5   :  { %v633_v48 = vpop.f32.mrf.mxu0 }
 0x1b6   :  { %v634_v63 = vadd.f32 %v633_v48, %v1731_v35  ;;  %v678_v44 = vmul.f32 0.02, %v632_v17 }
 0x1b7   :  { %v637_v49 = vpop.f32.mrf.mxu0 }
 0x1b8   :  { %v638_v10 = vadd.f32 %v637_v49, %v1725_v32  ;;  %v710_v28 = vmax.f32 %v632_v17, %v678_v44  ;;  %v776_v44 = vpop.permute.xlu1 %775 }
 0x1b9   :  { %v639_v50 = vpop.f32.mrf.mxu0 }
 0x1ba   :  { %v640_v61 = vadd.f32 %v639_v50, %v1725_v32  ;;  %v628_v50 = vadd.f32 %v627_v45, %v1729_v34  ;;  %v620_v32 = vadd.f32 %v619_v42, %v1733_v36  ;;  %v610_v42 = vadd.f32 %v1763_v26, %v1737_v38 }
 0x1bb   :  { %v641_v51 = vpop.f32.mrf.mxu0 }
 0x1bc   :  { %v642_v0 = vadd.f32 %v641_v51, %v1727_v33  ;;  %v681_v13 = vmul.f32 0.02, %v640_v61  ;;  %v676_v45 = vmul.f32 0.02, %v628_v50 }
 0x1bd   :  { %v643_v52 = vpop.f32.mrf.mxu0 }
 0x1be   :  { %v644_v55 = vadd.f32 %v643_v52, %v1727_v33  ;;  %v682_v18 = vmul.f32 0.02, %v642_v0  ;;  %v679_v33 = vmul.f32 0.02, %v634_v63  ;;  %v708_v26 = vmax.f32 %v628_v50, %v676_v45 }
 0x1bf   :  { %v647_v53 = vpop.f32.mrf.mxu0 }
 0x1c0   :  { %v648_v58 = vadd.f32 %v647_v53, %v1721_v30  ;;  %v683_v3 = vmul.f32 0.02, %v644_v55  ;;  %v622_v53 = vadd.f32 %v621_v43, %v1735_v37  ;;  %v612_v37 = vadd.f32 %v1765_v27, %v1739_v39 }
 0x1c1   :  { %v649_v54 = vpop.f32.mrf.mxu0  ;;  %v602_v27 = vadd.f32 %v1755_v22, %v1743_v41 }
 0x1c2   :  { %v650_v56 = vadd.f32 %v649_v54, %v1721_v30  ;;  %v684_v12 = vmul.f32 0.02, %v648_v58  ;;  %v630_v30 = vadd.f32 %v629_v46, %v1729_v34  ;;  %v715_v5 = vmax.f32 %v644_v55, %v683_v3 }
 0x1c3   :  { %v651_v59 = vpop.f32.mrf.mxu0  ;;  %v713_v46 = vmax.f32 %v640_v61, %v681_v13  ;;  %v714_v54 = vmax.f32 %v642_v0, %v682_v18  ;;  %v711_v55 = vmax.f32 %v634_v63, %v679_v33  ;;  %v618_v34 = vadd.f32 %v617_v29, %v1733_v36 }
 0x1c4   :  { %v652_v62 = vadd.f32 %v651_v59, %v1723_v31  ;;  %v685_v4 = vmul.f32 0.02, %v650_v56  ;;  %v716_v51 = vmax.f32 %v648_v58, %v684_v12  ;;  %v677_v49 = vmul.f32 0.02, %v630_v30 }
 0x1c5   :  { %v653_v1 = vpop.f32.mrf.mxu0  ;;  %v675_v59 = vmul.f32 0.02, %v624_v15  ;;  %v673_v61 = vmul.f32 0.02, %v620_v32  ;;  %v674_v43 = vmul.f32 0.02, %v622_v53  ;;  %v604_v63 = vadd.f32 %v1759_v24, %v1743_v41 }
 0x1c6   :  { %v686_v8 = vmul.f32 0.02, %v652_v62  ;;  %v654_v9 = vadd.f32 %v653_v1, %v1723_v31  ;;  %v717_v21 = vmax.f32 %v650_v56, %v685_v4  ;;  %v680_v31 = vmul.f32 0.02, %v638_v10 }
 0x1c7   :  { %v749_v56 = vpack.c.bf16 %v715_v5, %v713_v46  ;;  %v671_v1 = vmul.f32 0.02, %v614_v47  ;;  %v707_v36 = vmax.f32 %v624_v15, %v675_v59  ;;  %v608_v3 = vadd.f32 %v1761_v25, %v1737_v38  ;;  %v1321_v46 = vld [vmem:[%s1926_s5 + $0x30] sm:$0xff]  }
 0x1c8   :  { %v687_v14 = vmul.f32 0.02, %v654_v9  ;;  %v718_v19 = vmax.f32 %v652_v62, %v686_v8  ;;  %v712_v58 = vmax.f32 %v638_v10, %v680_v31  ;;  %v709_v62 = vmax.f32 %v630_v30, %v677_v49  ;;  %v1316_v49 = vld [vmem:[%s1926_s5 + $0x8] sm:$0xff]  }
 0x1c9   :  { %v672_v4 = vmul.f32 0.02, %v618_v34  ;;  %v600_v8 = vadd.f32 %v1751_v20, %v1741_v40  ;;  %v705_v39 = vmax.f32 %v620_v32, %v673_v61  ;;  %v670_v10 = vmul.f32 0.02, %v612_v37  ;;  %v1315_v32 = vld [vmem:[%s1926_s5] sm:$0xff]  }
 0x1ca   :  { %v719_v48 = vmax.f32 %v654_v9, %v687_v14  ;;  %v750_v35 = vpack.c.bf16 %v718_v19, %v716_v51  ;;  %v748_v0 = vpack.c.bf16 %v714_v54, %v712_v58  ;;  %v747_v29 = vpack.c.bf16 %v711_v55, %v709_v62 }
 0x1cb   :  { %v669_v9 = vmul.f32 0.02, %v610_v42  ;;  %v706_v24 = vmax.f32 %v622_v53, %v674_v43  ;;  %v746_v12 = vpack.c.bf16 %v710_v28, %v708_v26  ;;  %v667_v30 = vmul.f32 0.02, %v604_v63  ;;  %v771_v53 = vpop.permute.xlu0 %770 }
 0x1cc   :  { %v751_v52 = vpack.c.bf16 %v719_v48, %v717_v21  ;;  %v703_v13 = vmax.f32 %v614_v47, %v671_v1  ;;  %v745_v14 = vpack.c.bf16 %v707_v36, %v705_v39  ;;  %v598_v38 = vadd.f32 %v1749_v16, %v1741_v40 }
 0x1cd   :  { %v668_v25 = vmul.f32 0.02, %v608_v3  ;;  %v704_v15 = vmax.f32 %v618_v34, %v672_v4  ;;  %v665_v17 = vmul.f32 0.02, %v600_v8  ;;  %v701_v20 = vmax.f32 %v610_v42, %v669_v9 }
 0x1ce   :  { %896 = vmatprep.subr.bf16.mxu1 %v751_v52  ;;  %v666_v18 = vmul.f32 0.02, %v602_v27  ;;  %v702_v19 = vmax.f32 %v612_v37, %v670_v10  ;;  %v699_v5 = vmax.f32 %v604_v63, %v667_v30  ;;  %v664_v22 = vmul.f32 0.02, %v598_v38  ;;  %v1322_v52 = vld [vmem:[%s1926_s5 + $0x38] sm:$0xff]  }
 0x1cf   :  { %897 = vmatpush1.bf16.msra.mxu1 %v750_v35  ;;  %v744_v33 = vpack.c.bf16 %v706_v24, %v704_v15  ;;  %v743_v41 = vpack.c.bf16 %v703_v13, %v701_v20  ;;  %v700_v21 = vmax.f32 %v608_v3, %v668_v25  ;;  %v697_v48 = vmax.f32 %v600_v8, %v665_v17  ;;  %v781_v54 = vpop.permute.xlu0 %780  ;;  %v786_v35 = vpop.permute.xlu1 %785 }
 0x1d0   :  { %898 = vmatprep.subr.bf16.mxu1 %v749_v56  ;;  %v698_v50 = vmax.f32 %v602_v27, %v666_v18  ;;  %v696_v40 = vmax.f32 %v598_v38, %v664_v22 }
 0x1d1   :  { %v742_v31 = vpack.c.bf16 %v702_v19, %v700_v21  ;;  %v741_v51 = vpack.c.bf16 %v699_v5, %v697_v48 }
 0x1d2   :  { %v740_v16 = vpack.c.bf16 %v698_v50, %v696_v40 }
 0x1d3   :  { %899 = vmatpush1.bf16.msra.mxu1 %v748_v0  ;;  %v791_v47 = vpop.permute.xlu0 %790  ;;  %v1833_v59 = vpop.permute.xlu1 %1091 }
 0x1d4   :  { %900 = vmatprep.subr.bf16.mxu1 %v747_v29 }
 0x1d7   :  { %901 = vmatpush1.bf16.msra.mxu1 %v746_v12  ;;  %v1835_v55 = vpop.permute.xlu0 %1096  ;;  %v1837_v56 = vpop.permute.xlu1 %795 }
 0x1d8   :  { %902 = vmatprep.subr.bf16.mxu1 %v745_v14 }
 0x1db   :  { %903 = vmatpush1.bf16.msra.mxu1 %v744_v33  ;;  %v1839_v34 = vpop.permute.xlu0 %1101  ;;  %v1841_v45 = vpop.permute.xlu1 %800 }
 0x1dc   :  { %904 = vmatprep.subr.bf16.mxu1 %v743_v41 }
 0x1df   :  { %905 = vmatpush1.bf16.msra.mxu1 %v742_v31  ;;  %v1843_v58 = vpop.permute.xlu0 %1106  ;;  %v1845_v62 = vpop.permute.xlu1 %805 }
 0x1e0   :  { %906 = vmatprep.subr.bf16.mxu1 %v741_v51 }
 0x1e3   :  { %907 = vmatpush1.bf16.msra.mxu1 %v740_v16  ;;  %v1847_v43 = vpop.permute.xlu0 %1111  ;;  %v1849_v63 = vpop.permute.xlu1 %810 }
 0x1e4   :  { %908 = vmatprep.subr.bf16.mxu1 %v1757_v23  ;;  %v1320_v23 = vld [vmem:[%s1926_s5 + $0x28] sm:$0xff]  }
 0x1e7   :  { %909 = vmatpush1.bf16.msra.mxu1 %v1753_v6  ;;  %v1319_v6 = vld [vmem:[%s1926_s5 + $0x20] sm:$0xff]   ;;  %v1851_v36 = vpop.permute.xlu0 %1116  ;;  %v1853_v4 = vpop.permute.xlu1 %815 }
 0x1e8   :  { %910 = vmatprep.subr.bf16.mxu1 %v1747_v11  ;;  %v1317_v11 = vld [vmem:[%s1926_s5 + $0x10] sm:$0xff]  }
 0x1eb   :  { %911 = vmatpush1.bf16.msra.mxu1 %v1745_v7  ;;  %v1318_v7 = vld [vmem:[%s1926_s5 + $0x18] sm:$0xff]   ;;  %v1855_v9 = vpop.permute.xlu0 %1121  ;;  %v1857_v13 = vpop.permute.xlu1 %820 }
 0x1ee   :  { %929 = vmatmul.mubr.bf16.vlgmr.msra.gmra.mxu1 %v1315_v32 }
 0x1ef   :  { %938 = vmatprep.mubr.bf16.mxu1 %v1349_v2  ;;  %v1859_v20 = vpop.permute.xlu0 %1126  ;;  %v1862_v16 = vpop.permute.xlu1 %825 }
 0x1f6   :  { %939 = vmatmul.mubr.bf16.gmra.mxu1 %v1316_v49 }
 0x1f7   :  { %948 = vmatprep.mubr.bf16.mxu1 %v1349_v2 }
 0x1fe   :  { %949 = vmatmul.mubr.bf16.gmra.mxu1 %v1317_v11 }
 0x1ff   :  { %958 = vmatprep.mubr.bf16.mxu1 %v1349_v2 }
 0x206   :  { %959 = vmatmul.mubr.bf16.gmra.mxu1 %v1318_v7 }
 0x207   :  { %968 = vmatprep.mubr.bf16.mxu1 %v1349_v2 }
 0x20e   :  { %969 = vmatmul.mubr.bf16.gmra.mxu1 %v1319_v6 }
 0x20f   :  { %978 = vmatprep.mubr.bf16.mxu1 %v1349_v2 }
 0x216   :  { %979 = vmatmul.mubr.bf16.gmra.mxu1 %v1320_v23 }
 0x217   :  { %988 = vmatprep.mubr.bf16.mxu1 %v1349_v2 }
 0x21e   :  { %989 = vmatmul.mubr.bf16.gmra.mxu1 %v1321_v46  ;;  %v1865_v46 = vpop.permute.xlu0 %1131 }
 0x21f   :  { %998 = vmatprep.mubr.bf16.mxu1 %v1349_v2 }
 0x226   :  { %999 = vmatmul.mubr.bf16.gmra.mxu1 %v1322_v52 }
 0x2ae   :  { %v930_v2 = vpop.f32.mrf.mxu1 }
 0x2af   :  { %v931_v27 = vadd.f32 %v930_v2, %v771_v53 }
 0x2b0   :  { %v932_v42 = vpop.f32.mrf.mxu1 }
 0x2b1   :  { %v1009_v25 = vmul.f32 0.02, %v931_v27  ;;  %v933_v15 = vadd.f32 %v932_v42, %v771_v53 }
 0x2b2   :  { %v934_v61 = vpop.f32.mrf.mxu1 }
 0x2b3   :  { %v935_v8 = vadd.f32 %v934_v61, %v776_v44  ;;  %v1041_v31 = vmax.f32 %v931_v27, %v1009_v25  ;;  %v1010_v51 = vmul.f32 0.02, %v933_v15  ;;  %v1880_v25 = vpop.permute.xlu0 %1136 }
 0x2b4   :  { %v936_v37 = vpop.f32.mrf.mxu1 }
 0x2b5   :  { %v1011_v12 = vmul.f32 0.02, %v935_v8  ;;  %v937_v30 = vadd.f32 %v936_v37, %v776_v44  ;;  %v1169_v2 = vmul.f32 %v1833_v59, %v1041_v31  ;;  %v1042_v42 = vmax.f32 %v933_v15, %v1010_v51 }
 0x2b6   :  { %v940_v28 = vpop.f32.mrf.mxu1 }
 0x2b7   :  { %v941_v10 = vadd.f32 %v940_v28, %v781_v54  ;;  %v1043_v5 = vmax.f32 %v935_v8, %v1011_v12  ;;  %v1012_v41 = vmul.f32 0.02, %v937_v30  ;;  %v1873_v8 = vpop.permute.xlu1 %830 }
 0x2b8   :  { %v942_v0 = vpop.f32.mrf.mxu1 }
 0x2b9   :  { %v943_v17 = vadd.f32 %v942_v0, %v781_v54  ;;  %v1013_v18 = vmul.f32 0.02, %v941_v10  ;;  %v1171_v7 = vmul.f32 %v1835_v55, %v1043_v5  ;;  %v1044_v6 = vmax.f32 %v937_v30, %v1012_v41 }
 0x2ba   :  { %v944_v1 = vpop.f32.mrf.mxu1 }
 0x2bb   :  { %v945_v14 = vadd.f32 %v944_v1, %v786_v35  ;;  %v1014_v40 = vmul.f32 0.02, %v943_v17  ;;  %v1045_v32 = vmax.f32 %v941_v10, %v1013_v18 }
 0x2bc   :  { %v946_v29 = vpop.f32.mrf.mxu1 }
 0x2bd   :  { %v1015_v22 = vmul.f32 0.02, %v945_v14  ;;  %v947_v21 = vadd.f32 %v946_v29, %v786_v35  ;;  %v1046_v61 = vmax.f32 %v943_v17, %v1014_v40  ;;  %v1173_v37 = vmul.f32 %v1839_v34, %v1045_v32  ;;  %v1888_v32 = vpop.permute.xlu1 %835 }
 0x2be   :  { %v950_v3 = vpop.f32.mrf.mxu1  ;;  %v1201_v29 = vadd.f32 %v1171_v7, %v1169_v2 }
 0x2bf   :  { %v951_v19 = vadd.f32 %v950_v3, %v791_v47  ;;  %v1047_v52 = vmax.f32 %v945_v14, %v1015_v22  ;;  %v1016_v53 = vmul.f32 0.02, %v947_v21  ;;  %v1172_v3 = vmul.f32 %v1835_v55, %v1044_v6 }
 0x2c0   :  { %v952_v26 = vpop.f32.mrf.mxu1  ;;  %v1170_v14 = vmul.f32 %v1833_v59, %v1042_v42  ;;  %v1202_v55 = vadd.f32 %v1201_v29, %v1173_v37 }
 0x2c1   :  { %v1017_v49 = vmul.f32 0.02, %v951_v19  ;;  %v953_v23 = vadd.f32 %v952_v26, %v791_v47  ;;  %v1048_v27 = vmax.f32 %v947_v21, %v1016_v53  ;;  %v1892_v53 = vpop.permute.xlu0 %1141 }
 0x2c2   :  { %v954_v39 = vpop.f32.mrf.mxu1  ;;  %v1222_v5 = vadd.f32 %v1172_v3, %v1170_v14 }
 0x2c3   :  { %v955_v48 = vadd.f32 %v954_v39, %v1837_v56  ;;  %v1049_v28 = vmax.f32 %v951_v19, %v1017_v49  ;;  %v1018_v26 = vmul.f32 0.02, %v953_v23  ;;  %v1175_v39 = vmul.f32 %v1843_v58, %v1047_v52 }
 0x2c4   :  { %v956_v24 = vpop.f32.mrf.mxu1 }
 0x2c5   :  { %v1019_v44 = vmul.f32 0.02, %v955_v48  ;;  %v957_v0 = vadd.f32 %v956_v24, %v1837_v56  ;;  %v1177_v15 = vmul.f32 %v1847_v43, %v1049_v28  ;;  %v1050_v41 = vmax.f32 %v953_v23, %v1018_v26 }
 0x2c6   :  { %v960_v38 = vpop.f32.mrf.mxu1  ;;  %v1203_v21 = vadd.f32 %v1202_v55, %v1175_v39  ;;  %v1147_v55 = vpop.permute.xlu0 %1146 }
 0x2c7   :  { %v961_v54 = vadd.f32 %v960_v38, %v1841_v45  ;;  %v1051_v10 = vmax.f32 %v955_v48, %v1019_v44  ;;  %v1174_v38 = vmul.f32 %v1839_v34, %v1046_v61  ;;  %v1020_v17 = vmul.f32 0.02, %v957_v0 }
 0x2c8   :  { %v962_v33 = vpop.f32.mrf.mxu1  ;;  %v1176_v34 = vmul.f32 %v1843_v58, %v1048_v27  ;;  %v1204_v49 = vadd.f32 %v1203_v21, %v1177_v15  ;;  %v1178_v23 = vmul.f32 %v1847_v43, %v1050_v41  ;;  %v841_v27 = vpop.permute.xlu1 %840 }
 0x2c9   :  { %v1021_v12 = vmul.f32 0.02, %v961_v54  ;;  %v963_v56 = vadd.f32 %v962_v33, %v1841_v45  ;;  %v1179_v45 = vmul.f32 %v1851_v36, %v1051_v10  ;;  %v1052_v7 = vmax.f32 %v957_v0, %v1020_v17 }
 0x2ca   :  { %v964_v50 = vpop.f32.mrf.mxu1 }
 0x2cb   :  { %v965_v1 = vadd.f32 %v964_v50, %v1845_v62  ;;  %v1053_v33 = vmax.f32 %v961_v54, %v1021_v12  ;;  %v1223_v50 = vadd.f32 %v1222_v5, %v1174_v38  ;;  %v1022_v31 = vmul.f32 0.02, %v963_v56 }
 0x2cc   :  { %v966_v11 = vpop.f32.mrf.mxu1  ;;  %v1205_v54 = vadd.f32 %v1204_v49, %v1179_v45  ;;  %v1180_v0 = vmul.f32 %v1851_v36, %v1052_v7 }
 0x2cd   :  { %v1023_v18 = vmul.f32 0.02, %v965_v1  ;;  %v967_v22 = vadd.f32 %v966_v11, %v1845_v62  ;;  %v1224_v44 = vadd.f32 %v1223_v50, %v1176_v34  ;;  %v1054_v42 = vmax.f32 %v963_v56, %v1022_v31  ;;  %v846_v50 = vpop.permute.xlu1 %845 }
 0x2ce   :  { %v970_v35 = vpop.f32.mrf.mxu1 }
 0x2cf   :  { %v971_v24 = vadd.f32 %v970_v35, %v1849_v63  ;;  %v1055_v6 = vmax.f32 %v965_v1, %v1023_v18  ;;  %v1024_v58 = vmul.f32 0.02, %v967_v22  ;;  %v1181_v35 = vmul.f32 %v1855_v9, %v1053_v33 }
 0x2d0   :  { %v972_v47 = vpop.f32.mrf.mxu1  ;;  %v1225_v3 = vadd.f32 %v1224_v44, %v1178_v23  ;;  %v1182_v38 = vmul.f32 %v1855_v9, %v1054_v42 }
 0x2d1   :  { %v1025_v51 = vmul.f32 0.02, %v971_v24  ;;  %v973_v40 = vadd.f32 %v972_v47, %v1849_v63  ;;  %v1183_v43 = vmul.f32 %v1859_v20, %v1055_v6  ;;  %v1056_v26 = vmax.f32 %v967_v22, %v1024_v58 }
 0x2d2   :  { %v974_v30 = vpop.f32.mrf.mxu1  ;;  %v1206_v10 = vadd.f32 %v1205_v54, %v1181_v35 }
 0x2d3   :  { %v975_v59 = vadd.f32 %v974_v30, %v1853_v4  ;;  %v1057_v61 = vmax.f32 %v971_v24, %v1025_v51  ;;  %v1026_v37 = vmul.f32 0.02, %v973_v40  ;;  %v1184_v5 = vmul.f32 %v1859_v20, %v1056_v26 }
 0x2d4   :  { %v976_v19 = vpop.f32.mrf.mxu1  ;;  %v1207_v15 = vadd.f32 %v1206_v10, %v1183_v43 }
 0x2d5   :  { %v1027_v52 = vmul.f32 0.02, %v975_v59  ;;  %v977_v63 = vadd.f32 %v976_v19, %v1853_v4  ;;  %v1185_v36 = vmul.f32 %v1865_v46, %v1057_v61  ;;  %v1058_v56 = vmax.f32 %v973_v40, %v1026_v37 }
 0x2d6   :  { %v980_v48 = vpop.f32.mrf.mxu1 }
 0x2d7   :  { %v981_v62 = vadd.f32 %v980_v48, %v1857_v13  ;;  %v1059_v39 = vmax.f32 %v975_v59, %v1027_v52  ;;  %v1028_v4 = vmul.f32 0.02, %v977_v63  ;;  %v1208_v33 = vadd.f32 %v1207_v15, %v1185_v36 }
 0x2d8   :  { %v982_v11 = vpop.f32.mrf.mxu1  ;;  %v1186_v48 = vmul.f32 %v1865_v46, %v1058_v56 }
 0x2d9   :  { %v1029_v1 = vmul.f32 0.02, %v981_v62  ;;  %v983_v47 = vadd.f32 %v982_v11, %v1857_v13  ;;  %v1226_v13 = vadd.f32 %v1225_v3, %v1180_v0  ;;  %v1187_v41 = vmul.f32 %v1880_v25, %v1059_v39  ;;  %v1152_v11 = vpop.permute.xlu0 %1151 }
 0x2da   :  { %v984_v2 = vpop.f32.mrf.mxu1  ;;  %v1060_v59 = vmax.f32 %v977_v63, %v1028_v4 }
 0x2db   :  { %v985_v28 = vadd.f32 %v984_v2, %v1862_v16  ;;  %v1061_v17 = vmax.f32 %v981_v62, %v1029_v1  ;;  %v1030_v18 = vmul.f32 0.02, %v983_v47  ;;  %v1227_v45 = vadd.f32 %v1226_v13, %v1182_v38 }
 0x2dc   :  { %v986_v29 = vpop.f32.mrf.mxu1  ;;  %v1209_v6 = vadd.f32 %v1208_v33, %v1187_v41  ;;  %v1188_v23 = vmul.f32 %v1880_v25, %v1060_v59 }
 0x2dd   :  { %v1031_v12 = vmul.f32 0.02, %v985_v28  ;;  %v987_v30 = vadd.f32 %v986_v29, %v1862_v16  ;;  %v1189_v31 = vmul.f32 %v1892_v53, %v1061_v17  ;;  %v1062_v51 = vmax.f32 %v983_v47, %v1030_v18 }
 0x2de   :  { %v990_v14 = vpop.f32.mrf.mxu1  ;;  %v1228_v7 = vadd.f32 %v1227_v45, %v1184_v5 }
 0x2df   :  { %v991_v24 = vadd.f32 %v990_v14, %v1873_v8  ;;  %v1063_v9 = vmax.f32 %v985_v28, %v1031_v12  ;;  %v1032_v21 = vmul.f32 0.02, %v987_v30  ;;  %v1210_v2 = vadd.f32 %v1209_v6, %v1189_v31 }
 0x2e0   :  { %v992_v19 = vpop.f32.mrf.mxu1  ;;  %v1229_v54 = vadd.f32 %v1228_v7, %v1186_v48  ;;  %v1190_v42 = vmul.f32 %v1892_v53, %v1062_v51 }
 0x2e1   :  { %v1033_v22 = vmul.f32 0.02, %v991_v24  ;;  %v993_v16 = vadd.f32 %v992_v19, %v1873_v8  ;;  %v1191_v58 = vmul.f32 %v1147_v55, %v1063_v9  ;;  %v1064_v52 = vmax.f32 %v987_v30, %v1032_v21  ;;  %v1162_v30 = vpop.permute.xlu0 %1161 }
 0x2e2   :  { %v994_v34 = vpop.f32.mrf.mxu1  ;;  %v1230_v47 = vadd.f32 %v1229_v54, %v1188_v23 }
 0x2e3   :  { %v1034_v40 = vmul.f32 0.02, %v993_v16  ;;  %v995_v20 = vadd.f32 %v994_v34, %v1888_v32  ;;  %v1065_v62 = vmax.f32 %v991_v24, %v1033_v22  ;;  %v1211_v29 = vadd.f32 %v1210_v2, %v1191_v58 }
 0x2e4   :  { %v996_v49 = vpop.f32.mrf.mxu1  ;;  %v1192_v25 = vmul.f32 %v1147_v55, %v1064_v52  ;;  %v1231_v14 = vadd.f32 %v1230_v47, %v1190_v42 }
 0x2e5   :  { %v997_v8 = vadd.f32 %v996_v49, %v1888_v32  ;;  %v1035_v44 = vmul.f32 0.02, %v995_v20  ;;  %v1066_v61 = vmax.f32 %v993_v16, %v1034_v40  ;;  %v1193_v0 = vmul.f32 %v1152_v11, %v1065_v62  ;;  %v1157_v32 = vpop.permute.xlu1 %1156 }
 0x2e6   :  { %v1000_v46 = vpop.f32.mrf.mxu1  ;;  %v1232_v15 = vadd.f32 %v1231_v14, %v1192_v25  ;;  %v1244_v62 = vstv %s1929_s8  ;;  %s1327_s8 = scalar_lea.vmem %s1279_s14, 32 }
 0x2e7   :  { %v1036_v35 = vmul.f32 0.02, %v997_v8  ;;  %v1001_v63 = vadd.f32 %v1000_v46, %v841_v27  ;;  %v1067_v37 = vmax.f32 %v995_v20, %v1035_v44  ;;  %v1194_v38 = vmul.f32 %v1152_v11, %v1066_v61  ;;  %p1328_p0 = scmp.ne.s32.totalorder %s1279_s14, %s1327_s8  ;;  %p1333_p2 = scmp.lt.s32.totalorder %s1327_s8, %s1327_s8 }
 0x2e8   :  { %v1002_v28 = vpop.f32.mrf.mxu1  ;;  %v1212_v36 = vadd.f32 %v1211_v29, %v1193_v0  ;;  %v1350_v46 = vmov 1966171168  }
 0x2e9   :  { %v1037_v43 = vmul.f32 0.02, %v1001_v63  ;;  %v1003_v1 = vadd.f32 %v1002_v28, %v841_v27  ;;  %v1068_v3 = vmax.f32 %v997_v8, %v1036_v35  ;;  %v1195_v39 = vmul.f32 %v1157_v32, %v1067_v37  ;;  %v1167_v55 = vpop.permute.xlu1 %1166  ;;  %p1334_p3 = por %p1333_p2, %p1332_p1 }
 0x2ea   :  { %v1004_v26 = vpop.f32.mrf.mxu1  ;;  %v1233_v5 = vadd.f32 %v1232_v15, %v1194_v38  ;;  %v1253_v54 = vunpack.c.l.s4 %v1350_v46 }
 0x2eb   :  { %v1069_v10 = vmax.f32 %v1001_v63, %v1037_v43  ;;  %v1038_v4 = vmul.f32 0.02, %v1003_v1  ;;  %v1005_v12 = vadd.f32 %v1004_v26, %v846_v50  ;;  %v1196_v27 = vmul.f32 %v1157_v32, %v1068_v3  ;;  %p1335_p4 = pnand %p1334_p3, %p1328_p0 }
 0x2ec   :  { %v1006_v53 = vpop.f32.mrf.mxu1  ;;  %v1213_v18 = vadd.f32 %v1212_v36, %v1195_v39  ;;  %v1254_v35 = vunpack.c.0.s8 %v1253_v54 }
 0x2ed   :  { %v1197_v56 = vmul.f32 %v1162_v30, %v1069_v10  ;;  %v1070_v24 = vmax.f32 %v1003_v1, %v1038_v4  ;;  %v1039_v13 = vmul.f32 0.02, %v1005_v12  ;;  %v1007_v17 = vadd.f32 %v1006_v53, %v846_v50 }
 0x2ee   :  { %v1234_v9 = vadd.f32 %v1233_v5, %v1196_v27  ;;  %v1257_v2 = vsub.s32 %v1254_v35, %v1581_v60 }
 0x2ef   :  { %v1071_v19 = vmax.f32 %v1005_v12, %v1039_v13  ;;  %v1198_v41 = vmul.f32 %v1162_v30, %v1070_v24  ;;  %v1040_v22 = vmul.f32 0.02, %v1007_v17  ;;  %v1214_v16 = vadd.f32 %v1213_v18, %v1197_v56 }
 0x2f1   :  { %v1199_v59 = vmul.f32 %v1167_v55, %v1071_v19  ;;  %v1072_v21 = vmax.f32 %v1007_v17, %v1040_v22  ;;  %v1235_v45 = vadd.f32 %v1234_v9, %v1198_v41 }
 0x2f3   :  { %v1215_v34 = vadd.f32 %v1214_v16, %v1199_v59  ;;  %v1200_v33 = vmul.f32 %v1167_v55, %v1072_v21 }
 0x2f5   :  { %v1216_v48 = vrot.slane %v1215_v34, 4  ;;  %v1236_v31 = vadd.f32 %v1235_v45, %v1200_v33 }
 0x2f7   :  { %v1217_v51 = vadd.f32 %v1216_v48, %v1215_v34  ;;  %v1237_v40 = vrot.slane %v1236_v31, 4 }
 0x2f9   :  { %v1218_v20 = vrot.slane %v1217_v51, 2  ;;  %v1238_v49 = vadd.f32 %v1237_v40, %v1236_v31 }
 0x2fb   :  { %v1219_v50 = vadd.f32 %v1218_v20, %v1217_v51  ;;  %v1239_v7 = vrot.slane %v1238_v49, 2 }
 0x2fd   :  { %v1220_v6 = vrot.slane %v1219_v50, 1  ;;  %v1240_v8 = vadd.f32 %v1239_v7, %v1238_v49 }
 0x2ff   :  { %v1221_v11 = vadd.f32 %v1220_v6, %v1219_v50  ;;  %v1241_v23 = vrot.slane %v1240_v8, 1 }
 0x301   :  { %v1245_v58 = vadd.f32 %v1244_v62, %v1221_v11  ;;  %v1242_v52 = vadd.f32 %v1241_v23, %v1240_v8 }
 0x303   :  { %v1246_v44 = vadd.f32 %v1244_v62, %v1242_v52  ;;  %1323 = vtanh.f32 %v1245_v58 }
 0x305   :  { %1325 = vtanh.f32 %v1246_v44 }
 0x310   :  { %v1324_v63 = vpop.eup %1323 }
 0x312   :  { %v1326_v42 = vpop.eup %1325 }
 0x313   :  { %v1251_v61 = vcombine.low %v1324_v63, %v1326_v42 }
 0x315   :  { %v1258_v37 = vrot.slane %v1251_v61, %v1257_v2 }
 0x317   :  { %v1265_v28 = vrot.slane %v1258_v37, %v1257_v2 }
 0x319   :  { %1271 = vst.msk [vmem:[#allocation3] sm:$0x3] %vm1269_vm0, %v1265_v28 }
 0x31a   :  { %1338 = shalt.err (!%p1335_p4)
}
 0x31b   :  { %1281 = dma.vmem_to_hbm [thread:$0]  %s1279_s14, 32, %s1930_s9, [#allocation4]  }
 0x31c   :  { %1347 = dma.done.wait [#allocation4], 32  }
 0x31d   :  { %1348 = vsyncadd [#allocation4], 4294967264 }
 0x31e   :  { %1285 = vsyncpa [#allocation4], 1 }

</bundles_post_ra>
